<compile_context>
chip_gen: v7x
topology: tpu7x:2x2x1
jax: 0.10.0
libtpu: 0.0.40
codegen_flags: <defaults>
</compile_context>

<pallas_src>
import jax
import jax.numpy as jnp
from jax.experimental import pallas as pl
from jax.experimental.pallas import tpu as pltpu


def _round_up(x, m):
    return ((x + m - 1) // m) * m


# ----------------------------- Pallas kernel ------------------------------ #
def _spectral_mix_kernel(x_ref, wr_ref, wi_ref, o_ref):
    """Per-mode complex channel mix, one fused MXU matmul per mode.

    x_ref : (bm, Bp, 2*Cip)  bf16   [xr | xi]
    wr_ref: (bm, Cip, Cop)   bf16
    wi_ref: (bm, Cip, Cop)   bf16
    o_ref : (bm, Bp, 2*Cop)  f32    [real | imag]
    """
    wr = wr_ref[...]
    wi = wi_ref[...]
    # Assemble [[wr, wi], [-wi, wr]] in VMEM (VPU work; weights hit HBM once).
    rhs = jnp.concatenate(
        [jnp.concatenate([wr, wi], axis=-1),
         jnp.concatenate([-wi, wr], axis=-1)],
        axis=1)                                            # (bm, 2Cip, 2Cop)
    o_ref[...] = jnp.einsum(
        "mbi,mio->mbo", x_ref[...], rhs,
        preferred_element_type=jnp.float32)


# --------------------------- weight pre-packing ---------------------------- #
def pack_spectral_weights(weights1):
    """One-time pack: complex (Cin, Cout, M) -> two bf16 (M, Cin_p, Cout_p)."""
    Cin, Cout, M = weights1.shape
    Cin_p = _round_up(Cin, 64)    # 2*Cin_p  multiple of 128 (lane-dense LHS)
    Cout_p = _round_up(Cout, 64)  # 2*Cout_p multiple of 128 (lane-dense out)
    wm = jnp.transpose(weights1, (2, 0, 1))                # (M, Cin, Cout)
    pad = ((0, 0), (0, Cin_p - Cin), (0, Cout_p - Cout))
    wr = jnp.pad(jnp.real(wm).astype(jnp.float32), pad).astype(jnp.bfloat16)
    wi = jnp.pad(jnp.imag(wm).astype(jnp.float32), pad).astype(jnp.bfloat16)
    return wr, wi


# ------------------------------ kernel wrapper ----------------------------- #
def compl_mul1d_pallas(x_modes, wr_p, wi_p, out_channels,
                       vmem_budget_bytes=12 * 1024 * 1024):
    """Complex per-mode channel mix, equivalent to einsum('bix,iox->box').

    x_modes: (B, Cin, M) complex64.  wr_p / wi_p: (M, Cin_p, Cout_p) bf16
    (from pack_spectral_weights).  Returns (B, out_channels, M) complex64.
    """
    B, Cin, M = x_modes.shape
    _, Cin_p, Cout_p = wr_p.shape
    B_p = _round_up(B, 8)

    # LHS pack: (M, B_p, 2*Cin_p) bf16 = [xr | xi], B/Cin zero-padded.
    xm = jnp.transpose(x_modes, (2, 0, 1))                 # (M, B, Cin)
    pad_bc = ((0, 0), (0, B_p - B), (0, Cin_p - Cin))
    xr = jnp.pad(jnp.real(xm), pad_bc)
    xi = jnp.pad(jnp.imag(xm), pad_bc)
    x_stk = jnp.concatenate([xr, xi], axis=-1).astype(jnp.bfloat16)

    # Mode tiling from a VMEM byte budget (double-buffered pipeline), with a
    # cap of cdiv(M, 2) so v7x's two TensorCores both get grid steps.
    per_mode_bytes = (B_p * 2 * Cin_p * 2          # x   (bf16)
                      + 2 * Cin_p * Cout_p * 2     # wr + wi (bf16)
                      + B_p * 2 * Cout_p * 4)      # out (f32)
    cap = max(1, vmem_budget_bytes // (2 * per_mode_bytes))
    block_m = int(min(cap, 64, max(1, pl.cdiv(M, 2))))
    n_steps = int(pl.cdiv(M, block_m))
    m_pad = n_steps * block_m

    if m_pad != M:
        x_stk = jnp.pad(x_stk, ((0, m_pad - M), (0, 0), (0, 0)))
        wr_p = jnp.pad(wr_p, ((0, m_pad - M), (0, 0), (0, 0)))
        wi_p = jnp.pad(wi_p, ((0, m_pad - M), (0, 0), (0, 0)))

    block_bytes = block_m * per_mode_bytes
    vmem_limit = int(min(48 * 1024 * 1024,
                         max(16 * 1024 * 1024, 4 * block_bytes + (4 << 20))))

    cost = pl.CostEstimate(
        flops=2 * m_pad * B_p * (2 * Cin_p) * (2 * Cout_p),
        transcendentals=0,
        bytes_accessed=(x_stk.size * 2 + wr_p.size * 2 + wi_p.size * 2
                        + m_pad * B_p * 2 * Cout_p * 4),
    )

    out = pl.pallas_call(
        _spectral_mix_kernel,
        out_shape=jax.ShapeDtypeStruct((m_pad, B_p, 2 * Cout_p), jnp.float32),
        grid_spec=pltpu.PrefetchScalarGridSpec(
            num_scalar_prefetch=0,
            grid=(n_steps,),
            in_specs=[
                pl.BlockSpec((block_m, B_p, 2 * Cin_p), lambda m: (m, 0, 0)),
                pl.BlockSpec((block_m, Cin_p, Cout_p), lambda m: (m, 0, 0)),
                pl.BlockSpec((block_m, Cin_p, Cout_p), lambda m: (m, 0, 0)),
            ],
            out_specs=pl.BlockSpec((block_m, B_p, 2 * Cout_p),
                                   lambda m: (m, 0, 0)),
        ),
        compiler_params=pltpu.CompilerParams(
            dimension_semantics=("parallel",),
            vmem_limit_bytes=vmem_limit),
        cost_estimate=cost,
    )(x_stk, wr_p, wi_p)

    out = out[:M, :B]                                      # (M, B, 2*Cout_p)
    out_c = (out[..., :out_channels]
             + 1j * out[..., Cout_p:Cout_p + out_channels]).astype(jnp.complex64)
    return jnp.transpose(out_c, (1, 2, 0))                 # (B, Cout, M)


# --------------------------- module forward pass --------------------------- #
def spectral_conv1d_forward(x, wr_p, wi_p, out_channels, modes1):
    """x: (B, Cin, N) f32; wr_p/wi_p: packed bf16 weights (see pack_spectral_weights)."""
    B, Cin, N = x.shape
    n_freq = N // 2 + 1

    # TODO(synk): rfft/irfft have no Pallas TPU primitive; computed in plain JAX.
    x_ft = jnp.fft.rfft(x, axis=-1)                        # (B, Cin, n_freq)

    out_low = compl_mul1d_pallas(x_ft[:, :, :modes1], wr_p, wi_p, out_channels)

    # Zero the untouched high modes via a pad (no zeros buffer + scatter pass).
    out_ft = jnp.pad(out_low, ((0, 0), (0, 0), (0, n_freq - modes1)))

    return jnp.fft.irfft(out_ft, n=N, axis=-1).astype(jnp.float32)


# ----------------------------------- main ---------------------------------- #
if __name__ == "__main__":
    # Small, deterministic setup consistent with SpectralConv1d(in, out, modes1)
    B, Cin, Cout, N, modes1 = 2, 4, 4, 16, 5

    key = jax.random.PRNGKey(0)
    k_x, k_wr, k_wi = jax.random.split(key, 3)

    # Deterministic parameter init mirroring:
    #   scale * torch.rand(Cin, Cout, modes1, dtype=torch.cfloat)
    scale = 1.0 / (Cin * Cout)
    w_real = jax.random.uniform(k_wr, (Cin, Cout, modes1), dtype=jnp.float32)
    w_imag = jax.random.uniform(k_wi, (Cin, Cout, modes1), dtype=jnp.float32)
    weights1 = (scale * (w_real + 1j * w_imag)).astype(jnp.complex64)

    x = jax.random.normal(k_x, (B, Cin, N), dtype=jnp.float32)

    # One-time weight pack (hoisted out of the per-call path).
    wr_p, wi_p = pack_spectral_weights(weights1)

    fwd = jax.jit(spectral_conv1d_forward, static_argnums=(3, 4))
    y = jax.block_until_ready(fwd(x, wr_p, wi_p, Cout, modes1))

    # Pure-JAX f32/complex64 reference of the full forward.
    x_ft_ref = jnp.fft.rfft(x, axis=-1)
    out_low_ref = jnp.einsum("bix,iox->box", x_ft_ref[:, :, :modes1], weights1)
    out_ft_ref = jnp.zeros((B, Cout, N // 2 + 1), dtype=jnp.complex64)
    out_ft_ref = out_ft_ref.at[:, :, :modes1].set(out_low_ref)
    y_ref = jnp.fft.irfft(out_ft_ref, n=N, axis=-1)

    assert y.shape == (B, Cout, N)
    # bf16 MXU operands (f32 accumulation) -> loosened tolerance vs f32 ref.
    assert jnp.allclose(y, y_ref, atol=3e-2, rtol=3e-2), \
        float(jnp.max(jnp.abs(y - y_ref)))
    print("KERNEL_OK")
</pallas_src>

<mosaic_0001>
module attributes {stable_mosaic.version = 11 : i64} {
  func.func @_spectral_mix_kernel(%arg0: i32, %arg1: memref<3x8x128xbf16, #tpu.memory_space<vmem>>, %arg2: memref<3x64x64xbf16, #tpu.memory_space<vmem>>, %arg3: memref<3x64x64xbf16, #tpu.memory_space<vmem>>, %arg4: memref<3x8x128xf32, #tpu.memory_space<vmem>>) attributes {dimension_semantics = [#tpu.dimension_semantics<parallel>], iteration_bounds = array<i64: 2>, scalar_prefetch = 0 : i64, scratch_operands = 0 : i64, tpu.core_type = #tpu.core_type<tc>, window_params = [{transform_indices = @transform_0, window_bounds = array<i64: 3, 8, 128>}, {transform_indices = @transform_1, window_bounds = array<i64: 3, 64, 64>}, {transform_indices = @transform_2, window_bounds = array<i64: 3, 64, 64>}, {transform_indices = @transform_3, window_bounds = array<i64: 3, 8, 128>}]} {
    %c0 = arith.constant 0 : index
    %c0_0 = arith.constant 0 : index
    %c0_1 = arith.constant 0 : index
    %0 = vector.load %arg2[%c0, %c0_0, %c0_1] : memref<3x64x64xbf16, #tpu.memory_space<vmem>>, vector<3x64x64xbf16>
    %c0_2 = arith.constant 0 : index
    %c0_3 = arith.constant 0 : index
    %c0_4 = arith.constant 0 : index
    %1 = vector.load %arg3[%c0_2, %c0_3, %c0_4] : memref<3x64x64xbf16, #tpu.memory_space<vmem>>, vector<3x64x64xbf16>
    %2 = tpu.concatenate %0, %1 in 2 : vector<3x64x64xbf16>, vector<3x64x64xbf16> -> vector<3x64x128xbf16>
    %cst = arith.constant 0.000000e+00 : bf16
    %3 = vector.broadcast %cst : bf16 to vector<3x64x64xbf16>
    %4 = arith.subf %3, %1 : vector<3x64x64xbf16>
    %5 = tpu.concatenate %4, %0 in 2 : vector<3x64x64xbf16>, vector<3x64x64xbf16> -> vector<3x64x128xbf16>
    %6 = tpu.concatenate %2, %5 in 1 : vector<3x64x128xbf16>, vector<3x64x128xbf16> -> vector<3x128x128xbf16>
    %c0_5 = arith.constant 0 : index
    %c0_6 = arith.constant 0 : index
    %c0_7 = arith.constant 0 : index
    %7 = vector.load %arg1[%c0_5, %c0_6, %c0_7] : memref<3x8x128xbf16, #tpu.memory_space<vmem>>, vector<3x8x128xbf16>
    "tpu.trace_start"() <{level = 10 : i32, message = "mbi,mio->mbo"}> : () -> ()
    %cst_8 = arith.constant dense<0.000000e+00> : vector<3x8x128xf32>
    %8 = tpu.matmul %7, %6, %cst_8 {dimension_numbers = #tpu.dot_dimension_numbers<[2], [1], [1], [2], [0, 0, 0, 1, 1, 2], [0], [0]>} : vector<3x8x128xbf16>, vector<3x128x128xbf16>, vector<3x8x128xf32> -> vector<3x8x128xf32>
    "tpu.trace_stop"() : () -> ()
    %c0_9 = arith.constant 0 : index
    %c0_10 = arith.constant 0 : index
    %c0_11 = arith.constant 0 : index
    %9 = vector.load %arg4[%c0_9, %c0_10, %c0_11] : memref<3x8x128xf32, #tpu.memory_space<vmem>>, vector<3x8x128xf32>
    tpu.vector_store %arg4[%c0_9, %c0_10, %c0_11], %8 {strides = array<i32>} : memref<3x8x128xf32, #tpu.memory_space<vmem>>, vector<3x8x128xf32>,
    return
  }
  func.func @transform_0(%arg0: i32) -> (i32, i32, i32) {
    %c0_i32 = arith.constant 0 : i32
    %c0_i32_0 = arith.constant 0 : i32
    %c0_i32_1 = arith.constant 0 : i32
    return %arg0, %c0_i32, %c0_i32_0 : i32, i32, i32
  }
  func.func @transform_1(%arg0: i32) -> (i32, i32, i32) {
    %c0_i32 = arith.constant 0 : i32
    %c0_i32_0 = arith.constant 0 : i32
    %c0_i32_1 = arith.constant 0 : i32
    return %arg0, %c0_i32, %c0_i32_0 : i32, i32, i32
  }
  func.func @transform_2(%arg0: i32) -> (i32, i32, i32) {
    %c0_i32 = arith.constant 0 : i32
    %c0_i32_0 = arith.constant 0 : i32
    %c0_i32_1 = arith.constant 0 : i32
    return %arg0, %c0_i32, %c0_i32_0 : i32, i32, i32
  }
  func.func @transform_3(%arg0: i32) -> (i32, i32, i32) {
    %c0_i32 = arith.constant 0 : i32
    %c0_i32_0 = arith.constant 0 : i32
    %c0_i32_1 = arith.constant 0 : i32
    return %arg0, %c0_i32, %c0_i32_0 : i32, i32, i32
  }
}

</mosaic_0001>

<bundles_post_ra>
// kernel: reverse.1
= control target key start
LH: loop header
LB: loop body
LE: loop exit
PB: predicated region body
PF: predicated region fallthrough
CT: control target
= control target key end

     0   :  { %s92_s0 = inlined_call_operand.vmem [shape: f32[2,4,7], index: 0, kind: input, shape index: {}]   ;;  %s93_s1 = inlined_call_operand.vmem [shape: f32[2,4,7], index: 1, kind: output, shape index: {}]  }
   0x1   :  { %v28_v0 = vld [vmem:[%s92_s0 + $0xc] sm:$0x3]  ;;  %v29_v1 = vld [vmem:[%s92_s0 + $0xa] sm:$0x3]  ;;  %v31_v2 = vld [vmem:[%s92_s0 + $0x8] sm:$0x3] }
   0x2   :  { %4 = vst [vmem:[%s93_s1] sm:$0x3] %v28_v0  ;;  %30 = vst [vmem:[%s93_s1 + $0x2] sm:$0x3] %v29_v1  ;;  %v33_v3 = vld [vmem:[%s92_s0 + $0x6] sm:$0x3] }
   0x3   :  { %32 = vst [vmem:[%s93_s1 + $0x4] sm:$0x3] %v31_v2  ;;  %v35_v4 = vld [vmem:[%s92_s0 + $0x4] sm:$0x3]  ;;  %v37_v5 = vld [vmem:[%s92_s0 + $0x2] sm:$0x3] }
   0x4   :  { %34 = vst [vmem:[%s93_s1 + $0x6] sm:$0x3] %v33_v3  ;;  %36 = vst [vmem:[%s93_s1 + $0x8] sm:$0x3] %v35_v4  ;;  %v25_v6 = vld [vmem:[%s92_s0] sm:$0x3] }
   0x5   :  { %38 = vst [vmem:[%s93_s1 + $0xa] sm:$0x3] %v37_v5  ;;  %39 = vst [vmem:[%s93_s1 + $0xc] sm:$0x3] %v25_v6 }

// kernel: spectral_conv1d_forward.1
= control target key start
LH: loop header
LB: loop body
LE: loop exit
PB: predicated region body
PF: predicated region fallthrough
CT: control target
= control target key end

     0   :  { %s1032_s12 = smov 0   ;;  %s1251_s0 = inlined_call_operand.vmem [shape: bf16[6,8,128], index: 0, kind: input, shape index: {}]   ;;  %s1252_s1 = inlined_call_operand.vmem [shape: bf16[6,64,64], index: 1, kind: input, shape index: {}]   ;;  %s1253_s2 = inlined_call_operand.vmem [shape: bf16[6,64,64], index: 2, kind: input, shape index: {}]   ;;  %s1254_s3 = inlined_call_operand.vmem [shape: f32[6,8,128], index: 3, kind: output, shape index: {}]  }
   0x1 LB: > { %s828_s13 = sadd.s32 4294967295, %s1007_s12   ;;  %p832_p0 = scmp.ge.s32.totalorder %s1007_s12, 1  ;;  %s1007_s12 = sphi %s1032_s12, %s13_s12  }
   0x2   : > { %p162_p1 = scmp.lt.s32.totalorder %s1007_s12, 3 }
   0x4   : > { %p163_p2 = pnand %p832_p0, %p162_p1 }
   0x5   : > { %s198_s14 = smul.u32 (!%p163_p2), 3, %s828_s13  ;;  %v1009_v0 = vmov (!%p163_p2), 0.0   ;;  %s1010_s19 = smov (!%p163_p2), 64   ;;  %vm1011_vm0 = vmmov (!%p163_p2), 0   ;;  %vm417_vm1 = vcmask (!%p163_p2), 523264  }
   0x6   : > { %166 = sbr.rel (%p163_p2) target bundleno = 413 (0x19d), region = 32  ;;  %906 = vmatprep.subr.bf16.mxu0 (!%p163_p2), %v1009_v0  ;;  %926 = vmatprep.subr.bf16.mxu1 (!%p163_p2), %v1009_v0 }
   0x7   : > { %p199_p3 = scmp.lt.s32.totalorder (!%p163_p2), %s198_s14, 5  ;;  %922 = vmatprep.mubr.msk.bf16.mxu0 (!%p163_p2), %vm1011_vm0, %v1009_v0  ;;  %942 = vmatprep.mubr.msk.bf16.mxu1 (!%p163_p2), %vm1011_vm0, %v1009_v0 }
   0xd   : > { %s1256_s14 = smov (!%p199_p3, %s198_s14), 5 }
   0xe   : > { %s877_s15 = sshll.u32 %s1256_s14, 5  ;;  %s833_s23 = sshll.u32 %s1256_s14, 2 }
   0xf   : > { %s1048_s18 = scalar_lea.vmem %s1253_s2, %s877_s15  ;;  %s1062_s22 = scalar_lea.vmem %s1252_s1, %s877_s15 }
  0x10   : > { %v249_v1 = vld [vmem:[%s1048_s18] sm:$0xf]  ;;  %v250_v2 = vld [vmem:[%s1048_s18 + $0x4] sm:$0xf]  ;;  %v251_v3 = vld [vmem:[%s1048_s18 + $0x8] sm:$0xf]  ;;  %s1199_s26 = scalar_lea.vmem %s1251_s0, %s833_s23 }
  0x11   : > { %v851_v4 = vcombine.low %v249_v1, %v250_v2  ;;  %v466_v5 = vsub.bf16 0, %v249_v1  ;;  %v467_v6 = vsub.bf16 0, %v250_v2  ;;  %v252_v7 = vld [vmem:[%s1048_s18 + $0xc] sm:$0xf]  ;;  %v253_v9 = vld [vmem:[%s1048_s18 + $0x10] sm:$0xf] }
  0x12   : > { %v852_v8 = vcombine.low %v251_v3, %v252_v7  ;;  %v254_v10 = vld [vmem:[%s1048_s18 + $0x14] sm:$0xf]  ;;  %v470_v13 = vsub.bf16 0, %v253_v9  ;;  %v255_v15 = vld [vmem:[%s1048_s18 + $0x18] sm:$0xf]  ;;  %v468_v17 = vsub.bf16 0, %v251_v3 }
  0x13   : > { %v1056_v11 = vcombine.low %v466_v5, %v467_v6  ;;  %393 = vrot.lane.b32.xlu0 %v851_v4, %s1010_s19  ;;  %v853_v12 = vcombine.low %v253_v9, %v254_v10  ;;  %v471_v14 = vsub.bf16 0, %v254_v10  ;;  %v256_v16 = vld [vmem:[%s1048_s18 + $0x1c] sm:$0xf]  ;;  %v469_v18 = vsub.bf16 0, %v252_v7  ;;  %v1071_v21 = vld [vmem:[%s1062_s22] sm:$0xff]   ;;  %v1077_v23 = vld [vmem:[%s1062_s22 + $0x8] sm:$0xff]  }
  0x14   : > { %v854_v20 = vcombine.low %v255_v15, %v256_v16  ;;  %v1082_v24 = vld [vmem:[%s1062_s22 + $0x10] sm:$0xff]   ;;  %v472_v25 = vsub.bf16 0, %v255_v15  ;;  %v473_v26 = vsub.bf16 0, %v256_v16  ;;  %v257_v27 = vld [vmem:[%s1048_s18 + $0x20] sm:$0xf]  ;;  %v1089_v29 = vld [vmem:[%s1062_s22 + $0x18] sm:$0xff]  }
  0x15   : > { %v1066_v19 = vcombine.low %v470_v13, %v471_v14  ;;  %397 = vrot.lane.b32.xlu1 %v853_v12, %s1010_s19  ;;  %v1073_v22 = vcombine.low %v468_v17, %v469_v18  ;;  %v258_v28 = vld [vmem:[%s1048_s18 + $0x24] sm:$0xf]  ;;  %v265_v30 = vld [vmem:[%s1048_s18 + $0x40] sm:$0xf]  ;;  %v259_v33 = vld [vmem:[%s1048_s18 + $0x28] sm:$0xf] }
  0x16   : > { %v266_v31 = vld [vmem:[%s1048_s18 + $0x44] sm:$0xf]  ;;  %v855_v32 = vcombine.low %v257_v27, %v258_v28  ;;  %v260_v34 = vld [vmem:[%s1048_s18 + $0x2c] sm:$0xf]  ;;  %v267_v35 = vld [vmem:[%s1048_s18 + $0x48] sm:$0xf]  ;;  %v1099_v37 = vcombine.low %v472_v25, %v473_v26 }
  0x17   : > { %395 = vrot.lane.b32.xlu0 %v852_v8, %s1010_s19  ;;  %v268_v36 = vld [vmem:[%s1048_s18 + $0x4c] sm:$0xf]  ;;  %v859_v38 = vcombine.low %v265_v30, %v266_v31  ;;  %v261_v39 = vld [vmem:[%s1048_s18 + $0x30] sm:$0xf]  ;;  %v856_v40 = vcombine.low %v259_v33, %v260_v34  ;;  %v262_v41 = vld [vmem:[%s1048_s18 + $0x34] sm:$0xf] }
  0x18   : > { %v860_v42 = vcombine.low %v267_v35, %v268_v36  ;;  %v269_v43 = vld [vmem:[%s1048_s18 + $0x50] sm:$0xf]  ;;  %v270_v44 = vld [vmem:[%s1048_s18 + $0x54] sm:$0xf]  ;;  %v857_v45 = vcombine.low %v261_v39, %v262_v41  ;;  %v263_v46 = vld [vmem:[%s1048_s18 + $0x38] sm:$0xf] }
  0x19   : > { %399 = vrot.lane.b32.xlu1 %v854_v20, %s1010_s19  ;;  %v264_v47 = vld [vmem:[%s1048_s18 + $0x3c] sm:$0xf]  ;;  %v861_v48 = vcombine.low %v269_v43, %v270_v44  ;;  %v271_v49 = vld [vmem:[%s1048_s18 + $0x58] sm:$0xf]  ;;  %v474_v52 = vsub.bf16 0, %v257_v27  ;;  %v475_v53 = vsub.bf16 0, %v258_v28 }
  0x1a   : > { %v272_v50 = vld [vmem:[%s1048_s18 + $0x5c] sm:$0xf]  ;;  %v858_v51 = vcombine.low %v263_v46, %v264_v47  ;;  %v482_v55 = vsub.bf16 0, %v265_v30  ;;  %v483_v56 = vsub.bf16 0, %v266_v31  ;;  %v993_v57 = vld [vmem:[%s1062_s22 + $0x20] sm:$0xff]   ;;  %v476_v58 = vsub.bf16 0, %v259_v33 }
  0x1b   : > { %550 = vrot.lane.b32.xlu0 %v1071_v21, %s1010_s19  ;;  %v862_v54 = vcombine.low %v271_v49, %v272_v50  ;;  %v477_v59 = vsub.bf16 0, %v260_v34  ;;  %v1125_v60 = vld [vmem:[%s1062_s22 + $0x40] sm:$0xff]   ;;  %v1127_v61 = vcombine.low %v474_v52, %v475_v53  ;;  %v484_v62 = vsub.bf16 0, %v267_v35  ;;  %v995_v1 = vld [vmem:[%s1062_s22 + $0x28] sm:$0xff]   ;;  %v997_v9 = vld [vmem:[%s1062_s22 + $0x30] sm:$0xff]   ;;  %s838_s27 = sshll.u32 %s1256_s14, 3 }
  0x1c   : > { %v485_v63 = vsub.bf16 0, %v268_v36  ;;  %v1131_v2 = vcombine.low %v482_v55, %v483_v56  ;;  %v478_v3 = vsub.bf16 0, %v261_v39  ;;  %v479_v4 = vsub.bf16 0, %v262_v41  ;;  %v1136_v5 = vld [vmem:[%s1062_s22 + $0x48] sm:$0xff]   ;;  %v1147_v14 = vld [vmem:[%s1062_s22 + $0x50] sm:$0xff]   ;;  %v999_v18 = vld [vmem:[%s1062_s22 + $0x38] sm:$0xff]   ;;  %s222_s30 = scalar_lea.vmem %s1254_s3, %s838_s27 }
  0x1d   : > { %552 = vrot.lane.b32.xlu1 %v1077_v23, %s1010_s19  ;;  %v1138_v6 = vcombine.low %v476_v58, %v477_v59  ;;  %v486_v7 = vsub.bf16 0, %v269_v43  ;;  %v487_v8 = vsub.bf16 0, %v270_v44  ;;  %v480_v12 = vsub.bf16 0, %v263_v46  ;;  %v1158_v25 = vld [vmem:[%s1062_s22 + $0x58] sm:$0xff]  }
  0x1e   : > { %v1142_v10 = vcombine.low %v484_v62, %v485_v63  ;;  %v481_v13 = vsub.bf16 0, %v264_v47  ;;  %v1149_v15 = vcombine.low %v478_v3, %v479_v4  ;;  %v488_v16 = vsub.bf16 0, %v271_v49  ;;  %v623_v3 = vld [vmem:[%s1199_s26 + $0x4] sm:$0xf] }
  0x1f   : > { %554 = vrot.lane.b32.xlu0 %v1082_v24, %s1010_s19  ;;  %v489_v17 = vsub.bf16 0, %v272_v50  ;;  %v1153_v20 = vcombine.low %v486_v7, %v487_v8  ;;  %v622_v50 = vld [vmem:[%s1199_s26] sm:$0xf] }
  0x20   : > { %v1160_v26 = vcombine.low %v480_v12, %v481_v13 }
  0x21   : > { %556 = vrot.lane.b32.xlu1 %v1089_v29, %s1010_s19  ;;  %v1163_v27 = vcombine.low %v488_v16, %v489_v17 }
  0x23   : > { %401 = vrot.lane.b32.xlu0 %v855_v32, %s1010_s19 }
  0x25   : > { %409 = vrot.lane.b32.xlu1 %v859_v38, %s1010_s19 }
  0x27   : > { %403 = vrot.lane.b32.xlu0 %v856_v40, %s1010_s19 }
  0x29   : > { %411 = vrot.lane.b32.xlu1 %v860_v42, %s1010_s19 }
  0x2b   : > { %405 = vrot.lane.b32.xlu0 %v857_v45, %s1010_s19 }
  0x2d   : > { %413 = vrot.lane.b32.xlu1 %v861_v48, %s1010_s19 }
  0x2f   : > { %407 = vrot.lane.b32.xlu0 %v858_v51, %s1010_s19 }
  0x31   : > { %415 = vrot.lane.b32.xlu1 %v862_v54, %s1010_s19 }
  0x33   : > { %558 = vrot.lane.b32.xlu0 %v993_v57, %s1010_s19 }
  0x35   : > { %566 = vrot.lane.b32.xlu1 %v1125_v60, %s1010_s19 }
  0x37   : > { %560 = vrot.lane.b32.xlu0 %v995_v1, %s1010_s19 }
  0x39   : > { %568 = vrot.lane.b32.xlu1 %v1136_v5, %s1010_s19 }
  0x3b   : > { %562 = vrot.lane.b32.xlu0 %v997_v9, %s1010_s19 }
  0x3d   : > { %570 = vrot.lane.b32.xlu1 %v1147_v14, %s1010_s19 }
  0x3f   : > { %564 = vrot.lane.b32.xlu0 %v999_v18, %s1010_s19 }
  0x41   : > { %572 = vrot.lane.b32.xlu1 %v1158_v25, %s1010_s19 }
  0x85   : > { %v394_v28 = vpop.permute.xlu0 %393 }
  0x86   : > { %v420_v30 = vsel %vm417_vm1, %v1071_v21, %v394_v28 }
  0x87   : > { %907 = vmatpush3.bf16.msra.mxu0 %v420_v30  ;;  %v398_v31 = vpop.permute.xlu1 %397 }
  0x88   : > { %908 = vmatprep.subr.bf16.mxu0 %v1009_v0  ;;  %v428_v35 = vsel %vm417_vm1, %v1082_v24, %v398_v31 }
  0x89   : > { %v396_v32 = vpop.permute.xlu0 %395 }
  0x8a   : > { %v424_v33 = vsel %vm417_vm1, %v1077_v23, %v396_v32 }
  0x8b   : > { %909 = vmatpush3.bf16.msra.mxu0 %v424_v33  ;;  %v400_v34 = vpop.permute.xlu1 %399 }
  0x8c   : > { %910 = vmatprep.subr.bf16.mxu0 %v1009_v0  ;;  %v432_v21 = vsel %vm417_vm1, %v1089_v29, %v400_v34 }
  0x8d   : > { %v551_v36 = vpop.permute.xlu0 %550 }
  0x8e   : > { %v576_v23 = vsel %vm417_vm1, %v1056_v11, %v551_v36 }
  0x8f   : > { %911 = vmatpush3.bf16.msra.mxu0 %v428_v35  ;;  %v553_v38 = vpop.permute.xlu1 %552 }
  0x90   : > { %912 = vmatprep.subr.bf16.mxu0 %v1009_v0  ;;  %v580_v29 = vsel %vm417_vm1, %v1073_v22, %v553_v38 }
  0x91   : > { %v555_v39 = vpop.permute.xlu0 %554 }
  0x92   : > { %v584_v45 = vsel %vm417_vm1, %v1066_v19, %v555_v39 }
  0x93   : > { %913 = vmatpush3.bf16.msra.mxu0 %v432_v21  ;;  %v557_v40 = vpop.permute.xlu1 %556 }
  0x94   : > { %914 = vmatprep.subr.bf16.mxu0 %v1009_v0  ;;  %v588_v48 = vsel %vm417_vm1, %v1099_v37, %v557_v40 }
  0x95   : > { %v402_v41 = vpop.permute.xlu0 %401 }
  0x96   : > { %v436_v24 = vsel %vm417_vm1, %v993_v57, %v402_v41 }
  0x97   : > { %915 = vmatpush3.bf16.msra.mxu0 %v576_v23  ;;  %927 = vmatpush3.bf16.msra.mxu1 %v436_v24  ;;  %v410_v42 = vpop.permute.xlu1 %409 }
  0x98   : > { %916 = vmatprep.subr.bf16.mxu0 %v1009_v0  ;;  %928 = vmatprep.subr.bf16.mxu1 %v1009_v0  ;;  %v452_v51 = vsel %vm417_vm1, %v1125_v60, %v410_v42 }
  0x99   : > { %v404_v43 = vpop.permute.xlu0 %403 }
  0x9a   : > { %v440_v44 = vsel %vm417_vm1, %v995_v1, %v404_v43 }
  0x9b   : > { %917 = vmatpush3.bf16.msra.mxu0 %v580_v29  ;;  %929 = vmatpush3.bf16.msra.mxu1 %v440_v44  ;;  %v412_v11 = vpop.permute.xlu1 %411 }
  0x9c   : > { %918 = vmatprep.subr.bf16.mxu0 %v1009_v0  ;;  %930 = vmatprep.subr.bf16.mxu1 %v1009_v0  ;;  %v456_v54 = vsel %vm417_vm1, %v1136_v5, %v412_v11 }
  0x9d   : > { %v406_v46 = vpop.permute.xlu0 %405 }
  0x9e   : > { %v444_v47 = vsel %vm417_vm1, %v997_v9, %v406_v46  ;;  %v624_v9 = vld [vmem:[%s1199_s26 + $0x8] sm:$0xf] }
  0x9f   : > { %919 = vmatpush3.bf16.msra.mxu0 %v584_v45  ;;  %931 = vmatpush3.bf16.msra.mxu1 %v444_v47  ;;  %v414_v22 = vpop.permute.xlu1 %413 }
  0xa0   : > { %920 = vmatprep.subr.bf16.mxu0 %v1009_v0  ;;  %932 = vmatprep.subr.bf16.mxu1 %v1009_v0  ;;  %v460_v58 = vsel %vm417_vm1, %v1147_v14, %v414_v22 }
  0xa1   : > { %v408_v19 = vpop.permute.xlu0 %407 }
  0xa2   : > { %v448_v49 = vsel %vm417_vm1, %v999_v18, %v408_v19 }
  0xa3   : > { %921 = vmatpush3.bf16.msra.mxu0 %v588_v48  ;;  %933 = vmatpush3.bf16.msra.mxu1 %v448_v49  ;;  %v416_v37 = vpop.permute.xlu1 %415 }
  0xa4   : > { %946 = vmatprep.subr.bf16.mxu0 %v1009_v0  ;;  %934 = vmatprep.subr.bf16.mxu1 %v1009_v0 }
  0xa5   : > { %v559_v52 = vpop.permute.xlu0 %558 }
  0xa6   : > { %923 = vmatmul.mubr.bf16.vlgmr.msra.gmra.mrb[0].mxu0 %v622_v50  ;;  %v592_v53 = vsel %vm417_vm1, %v1127_v61, %v559_v52  ;;  %v464_v61 = vsel %vm417_vm1, %v1158_v25, %v416_v37 }
  0xa7   : > { %947 = vmatpush3.bf16.msra.mxu0 %v452_v51  ;;  %935 = vmatpush3.bf16.msra.mxu1 %v592_v53  ;;  %v567_v57 = vpop.permute.xlu1 %566 }
  0xa8   : > { %948 = vmatprep.subr.bf16.mxu0 %v1009_v0  ;;  %936 = vmatprep.subr.bf16.mxu1 %v1009_v0  ;;  %v608_v4 = vsel %vm417_vm1, %v1131_v2, %v567_v57 }
  0xa9   : > { %v561_v55 = vpop.permute.xlu0 %560  ;;  %962 = vmatprep.mubr.msk.bf16.mxu0 %vm1011_vm0, %v1009_v0 }
  0xaa   : > { %v596_v56 = vsel %vm417_vm1, %v1138_v6, %v561_v55 }
  0xab   : > { %949 = vmatpush3.bf16.msra.mxu0 %v456_v54  ;;  %937 = vmatpush3.bf16.msra.mxu1 %v596_v56  ;;  %v569_v62 = vpop.permute.xlu1 %568 }
  0xac   : > { %950 = vmatprep.subr.bf16.mxu0 %v1009_v0  ;;  %938 = vmatprep.subr.bf16.mxu1 %v1009_v0  ;;  %v612_v6 = vsel %vm417_vm1, %v1142_v10, %v569_v62 }
  0xad   : > { %v563_v59 = vpop.permute.xlu0 %562 }
  0xae   : > { %v600_v60 = vsel %vm417_vm1, %v1149_v15, %v563_v59 }
  0xaf   : > { %951 = vmatpush3.bf16.msra.mxu0 %v460_v58  ;;  %939 = vmatpush3.bf16.msra.mxu1 %v600_v60  ;;  %v571_v5 = vpop.permute.xlu1 %570 }
  0xb0   : > { %952 = vmatprep.subr.bf16.mxu0 %v1009_v0  ;;  %940 = vmatprep.subr.bf16.mxu1 %v1009_v0  ;;  %v616_v7 = vsel %vm417_vm1, %v1153_v20, %v571_v5 }
  0xb1   : > { %v565_v63 = vpop.permute.xlu0 %564 }
  0xb2   : > { %v604_v1 = vsel %vm417_vm1, %v1160_v26, %v565_v63 }
  0xb3   : > { %953 = vmatpush3.bf16.msra.mxu0 %v464_v61  ;;  %941 = vmatpush3.bf16.msra.mxu1 %v604_v1  ;;  %v573_v8 = vpop.permute.xlu1 %572 }
  0xb4   : > { %954 = vmatprep.subr.bf16.mxu0 %v1009_v0  ;;  %v620_v2 = vsel %vm417_vm1, %v1163_v27, %v573_v8 }
  0xb6   : > { %943 = vmatmul.mubr.bf16.vlgmr.msra.gmra.mrb[0].mxu1 %v623_v3 }
  0xb7   : > { %955 = vmatpush3.bf16.msra.mxu0 %v608_v4 }
  0xb8   : > { %956 = vmatprep.subr.bf16.mxu0 %v1009_v0 }
  0xbb   : > { %957 = vmatpush3.bf16.msra.mxu0 %v612_v6 }
  0xbc   : > { %958 = vmatprep.subr.bf16.mxu0 %v1009_v0 }
  0xbf   : > { %959 = vmatpush3.bf16.msra.mxu0 %v616_v7 }
  0xc0   : > { %960 = vmatprep.subr.bf16.mxu0 %v1009_v0 }
  0xc3   : > { %961 = vmatpush3.bf16.msra.mxu0 %v620_v2 }
  0xc6   : > { %963 = vmatmul.mubr.bf16.vlgmr.msra.gmra.mrb[4].mxu0 %v624_v9 }
 0x179   : > { %v659_v10 = vpop.f32.mrb[0].mxu0 }
 0x17a   : > { %745 = vst [vmem:[%s222_s30] sm:$0xff] %v659_v10  ;;  %v924_v12 = vpop.f32.mrb[1].mxu0 }
 0x17b   : > { %v662_v13 = vpop.f32.mrb[2].mxu0 }
 0x17c   : > { %v925_v14 = vpop.f32.mrb[3].mxu0 }
 0x189   : > { %v699_v15 = vpop.f32.mrb[0].mxu1 }
 0x18a   : > { %746 = vst [vmem:[%s222_s30 + $0x8] sm:$0xff] %v699_v15  ;;  %v944_v16 = vpop.f32.mrb[1].mxu1 }
 0x18b   : > { %v702_v17 = vpop.f32.mrb[2].mxu1 }
 0x18c   : > { %v945_v18 = vpop.f32.mrb[3].mxu1 }
 0x199   : > { %v739_v20 = vpop.f32.mrb[4].mxu0 }
 0x19a   : > { %747 = vst [vmem:[%s222_s30 + $0x10] sm:$0xff] %v739_v20  ;;  %v964_v0 = vpop.f32.mrb[5].mxu0 }
 0x19b   : > { %v742_v25 = vpop.f32.mrb[6].mxu0 }
 0x19c   : > { %v965_v26 = vpop.f32.mrb[7].mxu0 }
 0x19d PF: > { %s13_s12 = sadd.s32 1, %s1007_s12  }
 0x19e   : > { %p10_p4 = scmp.ge.s32.totalorder %s13_s12, 4  }
 0x1a0   :  { %12 = sbr.rel (!%p10_p4) target bundleno = 1 (0x1), region = 68 }

</bundles_post_ra>
